<compile_context>
chip_gen: v6e
topology: v6e:2x2x1
jax: 0.10.0
libtpu: 0.0.40
codegen_flags: <defaults>
</compile_context>

<pallas_src>
import functools

import jax
import jax.numpy as jnp
from jax.experimental import pallas as pl
from jax.experimental.pallas import tpu as pltpu


def attention_kernel(x_ref, wqkv_ref, bqkv_ref, wproj_ref, bproj_ref, o_ref, ctx_ref,
                     *, num_heads, n_valid):
    Bb, N, C = x_ref.shape
    H = num_heads
    D = C // H
    cdtype = x_ref.dtype  # MXU operand dtype (bf16 when the model runs in bf16)

    # ---- fused qkv projection for ALL heads: (Bb*N, C) @ (C, 3C), f32 accumulation ----
    x2d = x_ref[...].reshape(Bb * N, C)
    qkv = jnp.dot(x2d, wqkv_ref[...], preferred_element_type=jnp.float32)
    qkv = qkv + bqkv_ref[...]
    # Column layout is PyTorch-native: [ q (C, head-major) | k (C) | v (C) ];
    # the softmax scale was folded into the q columns/bias in the wrapper.
    q2d = qkv[:, 0 * C:1 * C].astype(cdtype)
    k2d = qkv[:, 1 * C:2 * C].astype(cdtype)
    v2d = qkv[:, 2 * C:3 * C].astype(cdtype)

    for h in range(H):  # static unroll; each head uses the MXU-friendly 3-D einsums
        sl = slice(h * D, (h + 1) * D)
        q_h = q2d[:, sl].reshape(Bb, N, D)
        k_h = k2d[:, sl].reshape(Bb, N, D)
        v_h = v2d[:, sl].reshape(Bb, N, D)

        # batched QK^T (contraction over D), f32 accumulation, no explicit transpose
        s = jnp.einsum('bnd,bmd->bnm', q_h, k_h, preferred_element_type=jnp.float32)
        if n_valid < N:  # mask padded key columns before the softmax (static path)
            col = jax.lax.broadcasted_iota(jnp.int32, (1, 1, N), 2)
            s = jnp.where(col < n_valid, s, -1e30)
        s = s - jnp.max(s, axis=-1, keepdims=True)
        p = jnp.exp(s)
        l = jnp.sum(p, axis=-1, keepdims=True)
        # attn_drop: Dropout(p=0.0) -> identity

        ctx = jnp.einsum('bnm,bmd->bnd', p.astype(cdtype), v_h,
                         preferred_element_type=jnp.float32)
        # normalize AFTER the PV matmul: (Bb,N,D) multiplies instead of (Bb,N,N)
        ctx = ctx * pl.reciprocal(l, approx=True)

        # head-concatenated context, consumed by ONE full-width projection below
        ctx_ref[:, sl] = ctx.reshape(Bb * N, D).astype(ctx_ref.dtype)

    # ---- single output projection over all heads: (Bb*N, C) @ (C, C), K = C depth ----
    out = jnp.dot(ctx_ref[...], wproj_ref[...], preferred_element_type=jnp.float32)
    out = out + bproj_ref[...]
    o_ref[...] = out.reshape(Bb, N, C).astype(o_ref.dtype)
    # proj_drop: Dropout(p=0.0) -> identity


def attention(x, w_qkv, b_qkv, w_proj, b_proj, *, num_heads, block_b=None):
    B, N, C = x.shape
    H = num_heads
    D = C // H
    scale = float(D) ** -0.5

    # ---- pad N to a sublane multiple so (Bb, N, C) <-> (Bb*N, C) reshapes are free ----
    n_valid = N
    N_pad = ((N + 7) // 8) * 8
    if N_pad != N:
        x = jnp.pad(x, ((0, 0), (0, N_pad - N), (0, 0)))

    # ---- block_b heuristic: fill the MXU M dim (>=512 rows), but keep >= 2 batch
    # ---- blocks so the "parallel" axis can shard across v7x's two TensorCores ----
    if block_b is None:
        divisors = [d for d in range(1, B + 1) if B % d == 0]
        cands = [d for d in divisors if B // d >= 2] or divisors
        good = [d for d in cands if d * N_pad >= 512]
        block_b = min(good) if good else max(cands)
    assert B % block_b == 0, "block_b must divide B"

    # ---- fold the softmax scale into the q columns (zero in-kernel score scaling) ----
    wqkv = w_qkv.at[:, :C].multiply(scale).astype(x.dtype)   # MXU operand dtype
    bqkv = b_qkv.at[:, :C].multiply(scale).astype(jnp.float32)
    wproj = w_proj.astype(x.dtype)
    bproj = b_proj.astype(jnp.float32)

    kernel = functools.partial(attention_kernel, num_heads=H, n_valid=n_valid)

    out = pl.pallas_call(
        kernel,
        out_shape=jax.ShapeDtypeStruct((B, N_pad, C), x.dtype),
        grid=(B // block_b,),
        in_specs=[
            pl.BlockSpec((block_b, N_pad, C), lambda b: (b, 0, 0)),   # x (per batch block)
            # weights/biases: constant index_map + full block -> fetched once, VMEM-resident
            pl.BlockSpec((C, 3 * C), lambda b: (0, 0)),               # fused qkv weight
            pl.BlockSpec((1, 3 * C), lambda b: (0, 0)),               # qkv bias (q-scaled)
            pl.BlockSpec((C, C), lambda b: (0, 0)),                   # proj weight
            pl.BlockSpec((1, C), lambda b: (0, 0)),                   # proj bias
        ],
        out_specs=pl.BlockSpec((block_b, N_pad, C), lambda b: (b, 0, 0)),
        scratch_shapes=[pltpu.VMEM((block_b * N_pad, C), x.dtype)],   # head-concat context
        compiler_params=pltpu.CompilerParams(
            dimension_semantics=("parallel",),
            vmem_limit_bytes=48 * 1024 * 1024),
    )(x, wqkv, bqkv, wproj, bproj)

    if N_pad != N:
        out = out[:, :N, :]
    return out


def attention_ref(x, w_qkv, b_qkv, w_proj, b_proj, *, num_heads):
    """Pure-JAX reference mirroring the PyTorch forward."""
    B, N, C = x.shape
    D = C // num_heads
    scale = D ** -0.5
    qkv = x @ w_qkv + b_qkv[0]                                   # (B, N, 3C)
    qkv = qkv.reshape(B, N, 3, num_heads, D).transpose(2, 0, 3, 1, 4)
    q, k, v = qkv[0], qkv[1], qkv[2]                             # (B, H, N, D)
    attn = jnp.einsum('bhnd,bhmd->bhnm', q, k) * scale
    attn = jax.nn.softmax(attn, axis=-1)
    out = jnp.einsum('bhnm,bhmd->bhnd', attn, v)
    out = out.transpose(0, 2, 1, 3).reshape(B, N, C)
    return out @ w_proj + b_proj[0]


if __name__ == "__main__":
    # Small shapes consistent with the module: dim=32, num_heads=4 (head_dim=8)
    B, N, C = 2, 8, 32
    num_heads = 4

    key = jax.random.PRNGKey(0)
    kx, kw1, kw2, kb2 = jax.random.split(key, 4)

    x = jax.random.normal(kx, (B, N, C), dtype=jnp.float32)

    # Deterministic synthetic parameters (qkv_bias=False -> zero qkv bias).
    w_qkv = jax.random.normal(kw1, (C, 3 * C), dtype=jnp.float32) * 0.05
    b_qkv = jnp.zeros((1, 3 * C), dtype=jnp.float32)
    w_proj = jax.random.normal(kw2, (C, C), dtype=jnp.float32) * 0.05
    b_proj = jax.random.normal(kb2, (1, C), dtype=jnp.float32) * 0.01

    out = attention(x, w_qkv, b_qkv, w_proj, b_proj, num_heads=num_heads)
    out = jax.block_until_ready(out)

    ref = attention_ref(x, w_qkv, b_qkv, w_proj, b_proj, num_heads=num_heads)
    assert out.shape == (B, N, C)
    # tolerance relaxed slightly vs pure-f32 because of pl.reciprocal(approx=True)
    assert jnp.allclose(out, ref, atol=2e-3, rtol=2e-3), "mismatch vs JAX reference"

    print("KERNEL_OK")
</pallas_src>

<mosaic_0001>
module attributes {stable_mosaic.version = 11 : i64} {
  func.func @attention_kernel(%arg0: i32, %arg1: memref<1x8x32xf32, #tpu.memory_space<vmem>>, %arg2: memref<32x96xf32, #tpu.memory_space<vmem>>, %arg3: memref<1x96xf32, #tpu.memory_space<vmem>>, %arg4: memref<32x32xf32, #tpu.memory_space<vmem>>, %arg5: memref<1x32xf32, #tpu.memory_space<vmem>>, %arg6: memref<1x8x32xf32, #tpu.memory_space<vmem>>, %arg7: memref<8x32xf32, #tpu.memory_space<vmem>>) attributes {dimension_semantics = [#tpu.dimension_semantics<parallel>], iteration_bounds = array<i64: 2>, scalar_prefetch = 0 : i64, scratch_operands = 1 : i64, tpu.core_type = #tpu.core_type<tc>, window_params = [{transform_indices = @transform_0, window_bounds = array<i64: 1, 8, 32>}, {pipeline_mode = #tpu.pipeline_mode<synchronous>, transform_indices = @transform_1, window_bounds = array<i64: 32, 96>}, {pipeline_mode = #tpu.pipeline_mode<synchronous>, transform_indices = @transform_2, window_bounds = array<i64: 1, 96>}, {pipeline_mode = #tpu.pipeline_mode<synchronous>, transform_indices = @transform_3, window_bounds = array<i64: 32, 32>}, {pipeline_mode = #tpu.pipeline_mode<synchronous>, transform_indices = @transform_4, window_bounds = array<i64: 1, 32>}, {transform_indices = @transform_5, window_bounds = array<i64: 1, 8, 32>}]} {
    %c0 = arith.constant 0 : index
    %c0_0 = arith.constant 0 : index
    %c0_1 = arith.constant 0 : index
    %0 = vector.load %arg1[%c0, %c0_0, %c0_1] : memref<1x8x32xf32, #tpu.memory_space<vmem>>, vector<1x8x32xf32>
    %1 = vector.shape_cast %0 : vector<1x8x32xf32> to vector<8x32xf32>
    %c0_2 = arith.constant 0 : index
    %c0_3 = arith.constant 0 : index
    %2 = vector.load %arg2[%c0_2, %c0_3] : memref<32x96xf32, #tpu.memory_space<vmem>>, vector<32x96xf32>
    %cst = arith.constant dense<0.000000e+00> : vector<8x96xf32>
    %3 = tpu.matmul %1, %2, %cst {dimension_numbers = #tpu.dot_dimension_numbers<[1], [0], [0], [1], [0, 0, 1, 1], [], []>} : vector<8x32xf32>, vector<32x96xf32>, vector<8x96xf32> -> vector<8x96xf32>
    %c0_4 = arith.constant 0 : index
    %c0_5 = arith.constant 0 : index
    %4 = vector.load %arg3[%c0_4, %c0_5] : memref<1x96xf32, #tpu.memory_space<vmem>>, vector<1x96xf32>
    %5 = vector.broadcast %4 : vector<1x96xf32> to vector<8x96xf32>
    %6 = arith.addf %3, %5 : vector<8x96xf32>
    %7 = vector.extract_strided_slice %6 {offsets = [0, 0], sizes = [8, 32], strides = [1, 1]} : vector<8x96xf32> to vector<8x32xf32>
    %8 = vector.extract_strided_slice %6 {offsets = [0, 32], sizes = [8, 32], strides = [1, 1]} : vector<8x96xf32> to vector<8x32xf32>
    %9 = vector.extract_strided_slice %6 {offsets = [0, 64], sizes = [8, 32], strides = [1, 1]} : vector<8x96xf32> to vector<8x32xf32>
    %10 = vector.extract_strided_slice %7 {offsets = [0, 0], sizes = [8, 8], strides = [1, 1]} : vector<8x32xf32> to vector<8x8xf32>
    %11 = vector.shape_cast %10 : vector<8x8xf32> to vector<1x8x8xf32>
    %12 = vector.extract_strided_slice %8 {offsets = [0, 0], sizes = [8, 8], strides = [1, 1]} : vector<8x32xf32> to vector<8x8xf32>
    %13 = vector.shape_cast %12 : vector<8x8xf32> to vector<1x8x8xf32>
    %14 = vector.extract_strided_slice %9 {offsets = [0, 0], sizes = [8, 8], strides = [1, 1]} : vector<8x32xf32> to vector<8x8xf32>
    %15 = vector.shape_cast %14 : vector<8x8xf32> to vector<1x8x8xf32>
    "tpu.trace_start"() <{level = 10 : i32, message = "bnd,bmd->bnm"}> : () -> ()
    %cst_6 = arith.constant dense<0.000000e+00> : vector<1x8x8xf32>
    %16 = tpu.matmul %11, %13, %cst_6 {dimension_numbers = #tpu.dot_dimension_numbers<[2], [2], [1], [1], [0, 0, 0, 1, 1, 1], [0], [0]>} : vector<1x8x8xf32>, vector<1x8x8xf32>, vector<1x8x8xf32> -> vector<1x8x8xf32>
    "tpu.trace_stop"() : () -> ()
    %cst_7 = arith.constant dense<0xFF800000> : vector<1x8xf32>
    %17 = vector.multi_reduction <maximumf>, %16, %cst_7 [2] : vector<1x8x8xf32> to vector<1x8xf32>
    %18 = vector.shape_cast %17 : vector<1x8xf32> to vector<1x8x1xf32>
    %19 = vector.broadcast %18 : vector<1x8x1xf32> to vector<1x8x8xf32>
    %20 = arith.subf %16, %19 : vector<1x8x8xf32>
    %21 = math.exp %20 : vector<1x8x8xf32>
    %cst_8 = arith.constant dense<0.000000e+00> : vector<1x8xf32>
    %22 = vector.multi_reduction <add>, %21, %cst_8 [2] : vector<1x8x8xf32> to vector<1x8xf32>
    %23 = vector.shape_cast %22 : vector<1x8xf32> to vector<1x8x1xf32>
    "tpu.trace_start"() <{level = 10 : i32, message = "bnm,bmd->bnd"}> : () -> ()
    %cst_9 = arith.constant dense<0.000000e+00> : vector<1x8x8xf32>
    %24 = tpu.matmul %21, %15, %cst_9 {dimension_numbers = #tpu.dot_dimension_numbers<[2], [1], [1], [2], [0, 0, 0, 1, 1, 2], [0], [0]>} : vector<1x8x8xf32>, vector<1x8x8xf32>, vector<1x8x8xf32> -> vector<1x8x8xf32>
    "tpu.trace_stop"() : () -> ()
    %25 = tpu.reciprocal %23 {approx = true} : vector<1x8x1xf32> -> vector<1x8x1xf32>
    %26 = vector.broadcast %25 : vector<1x8x1xf32> to vector<1x8x8xf32>
    %27 = arith.mulf %24, %26 : vector<1x8x8xf32>
    %28 = vector.shape_cast %27 : vector<1x8x8xf32> to vector<8x8xf32>
    %c0_10 = arith.constant 0 : index
    %c0_11 = arith.constant 0 : index
    %29 = vector.load %arg7[%c0_10, %c0_11] : memref<8x32xf32, #tpu.memory_space<vmem>>, vector<8x8xf32>
    tpu.vector_store %arg7[%c0_10, %c0_11], %28 {strides = array<i32>} : memref<8x32xf32, #tpu.memory_space<vmem>>, vector<8x8xf32>,
    %30 = vector.extract_strided_slice %7 {offsets = [0, 8], sizes = [8, 8], strides = [1, 1]} : vector<8x32xf32> to vector<8x8xf32>
    %31 = vector.shape_cast %30 : vector<8x8xf32> to vector<1x8x8xf32>
    %32 = vector.extract_strided_slice %8 {offsets = [0, 8], sizes = [8, 8], strides = [1, 1]} : vector<8x32xf32> to vector<8x8xf32>
    %33 = vector.shape_cast %32 : vector<8x8xf32> to vector<1x8x8xf32>
    %34 = vector.extract_strided_slice %9 {offsets = [0, 8], sizes = [8, 8], strides = [1, 1]} : vector<8x32xf32> to vector<8x8xf32>
    %35 = vector.shape_cast %34 : vector<8x8xf32> to vector<1x8x8xf32>
    "tpu.trace_start"() <{level = 10 : i32, message = "bnd,bmd->bnm"}> : () -> ()
    %cst_12 = arith.constant dense<0.000000e+00> : vector<1x8x8xf32>
    %36 = tpu.matmul %31, %33, %cst_12 {dimension_numbers = #tpu.dot_dimension_numbers<[2], [2], [1], [1], [0, 0, 0, 1, 1, 1], [0], [0]>} : vector<1x8x8xf32>, vector<1x8x8xf32>, vector<1x8x8xf32> -> vector<1x8x8xf32>
    "tpu.trace_stop"() : () -> ()
    %cst_13 = arith.constant dense<0xFF800000> : vector<1x8xf32>
    %37 = vector.multi_reduction <maximumf>, %36, %cst_13 [2] : vector<1x8x8xf32> to vector<1x8xf32>
    %38 = vector.shape_cast %37 : vector<1x8xf32> to vector<1x8x1xf32>
    %39 = vector.broadcast %38 : vector<1x8x1xf32> to vector<1x8x8xf32>
    %40 = arith.subf %36, %39 : vector<1x8x8xf32>
    %41 = math.exp %40 : vector<1x8x8xf32>
    %cst_14 = arith.constant dense<0.000000e+00> : vector<1x8xf32>
    %42 = vector.multi_reduction <add>, %41, %cst_14 [2] : vector<1x8x8xf32> to vector<1x8xf32>
    %43 = vector.shape_cast %42 : vector<1x8xf32> to vector<1x8x1xf32>
    "tpu.trace_start"() <{level = 10 : i32, message = "bnm,bmd->bnd"}> : () -> ()
    %cst_15 = arith.constant dense<0.000000e+00> : vector<1x8x8xf32>
    %44 = tpu.matmul %41, %35, %cst_15 {dimension_numbers = #tpu.dot_dimension_numbers<[2], [1], [1], [2], [0, 0, 0, 1, 1, 2], [0], [0]>} : vector<1x8x8xf32>, vector<1x8x8xf32>, vector<1x8x8xf32> -> vector<1x8x8xf32>
    "tpu.trace_stop"() : () -> ()
    %45 = tpu.reciprocal %43 {approx = true} : vector<1x8x1xf32> -> vector<1x8x1xf32>
    %46 = vector.broadcast %45 : vector<1x8x1xf32> to vector<1x8x8xf32>
    %47 = arith.mulf %44, %46 : vector<1x8x8xf32>
    %48 = vector.shape_cast %47 : vector<1x8x8xf32> to vector<8x8xf32>
    %c0_16 = arith.constant 0 : index
    %c8 = arith.constant 8 : index
    %49 = vector.load %arg7[%c0_16, %c8] : memref<8x32xf32, #tpu.memory_space<vmem>>, vector<8x8xf32>
    tpu.vector_store %arg7[%c0_16, %c8], %48 {strides = array<i32>} : memref<8x32xf32, #tpu.memory_space<vmem>>, vector<8x8xf32>,
    %50 = vector.extract_strided_slice %7 {offsets = [0, 16], sizes = [8, 8], strides = [1, 1]} : vector<8x32xf32> to vector<8x8xf32>
    %51 = vector.shape_cast %50 : vector<8x8xf32> to vector<1x8x8xf32>
    %52 = vector.extract_strided_slice %8 {offsets = [0, 16], sizes = [8, 8], strides = [1, 1]} : vector<8x32xf32> to vector<8x8xf32>
    %53 = vector.shape_cast %52 : vector<8x8xf32> to vector<1x8x8xf32>
    %54 = vector.extract_strided_slice %9 {offsets = [0, 16], sizes = [8, 8], strides = [1, 1]} : vector<8x32xf32> to vector<8x8xf32>
    %55 = vector.shape_cast %54 : vector<8x8xf32> to vector<1x8x8xf32>
    "tpu.trace_start"() <{level = 10 : i32, message = "bnd,bmd->bnm"}> : () -> ()
    %cst_17 = arith.constant dense<0.000000e+00> : vector<1x8x8xf32>
    %56 = tpu.matmul %51, %53, %cst_17 {dimension_numbers = #tpu.dot_dimension_numbers<[2], [2], [1], [1], [0, 0, 0, 1, 1, 1], [0], [0]>} : vector<1x8x8xf32>, vector<1x8x8xf32>, vector<1x8x8xf32> -> vector<1x8x8xf32>
    "tpu.trace_stop"() : () -> ()
    %cst_18 = arith.constant dense<0xFF800000> : vector<1x8xf32>
    %57 = vector.multi_reduction <maximumf>, %56, %cst_18 [2] : vector<1x8x8xf32> to vector<1x8xf32>
    %58 = vector.shape_cast %57 : vector<1x8xf32> to vector<1x8x1xf32>
    %59 = vector.broadcast %58 : vector<1x8x1xf32> to vector<1x8x8xf32>
    %60 = arith.subf %56, %59 : vector<1x8x8xf32>
    %61 = math.exp %60 : vector<1x8x8xf32>
    %cst_19 = arith.constant dense<0.000000e+00> : vector<1x8xf32>
    %62 = vector.multi_reduction <add>, %61, %cst_19 [2] : vector<1x8x8xf32> to vector<1x8xf32>
    %63 = vector.shape_cast %62 : vector<1x8xf32> to vector<1x8x1xf32>
    "tpu.trace_start"() <{level = 10 : i32, message = "bnm,bmd->bnd"}> : () -> ()
    %cst_20 = arith.constant dense<0.000000e+00> : vector<1x8x8xf32>
    %64 = tpu.matmul %61, %55, %cst_20 {dimension_numbers = #tpu.dot_dimension_numbers<[2], [1], [1], [2], [0, 0, 0, 1, 1, 2], [0], [0]>} : vector<1x8x8xf32>, vector<1x8x8xf32>, vector<1x8x8xf32> -> vector<1x8x8xf32>
    "tpu.trace_stop"() : () -> ()
    %65 = tpu.reciprocal %63 {approx = true} : vector<1x8x1xf32> -> vector<1x8x1xf32>
    %66 = vector.broadcast %65 : vector<1x8x1xf32> to vector<1x8x8xf32>
    %67 = arith.mulf %64, %66 : vector<1x8x8xf32>
    %68 = vector.shape_cast %67 : vector<1x8x8xf32> to vector<8x8xf32>
    %c0_21 = arith.constant 0 : index
    %c16 = arith.constant 16 : index
    %69 = vector.load %arg7[%c0_21, %c16] : memref<8x32xf32, #tpu.memory_space<vmem>>, vector<8x8xf32>
    tpu.vector_store %arg7[%c0_21, %c16], %68 {strides = array<i32>} : memref<8x32xf32, #tpu.memory_space<vmem>>, vector<8x8xf32>,
    %70 = vector.extract_strided_slice %7 {offsets = [0, 24], sizes = [8, 8], strides = [1, 1]} : vector<8x32xf32> to vector<8x8xf32>
    %71 = vector.shape_cast %70 : vector<8x8xf32> to vector<1x8x8xf32>
    %72 = vector.extract_strided_slice %8 {offsets = [0, 24], sizes = [8, 8], strides = [1, 1]} : vector<8x32xf32> to vector<8x8xf32>
    %73 = vector.shape_cast %72 : vector<8x8xf32> to vector<1x8x8xf32>
    %74 = vector.extract_strided_slice %9 {offsets = [0, 24], sizes = [8, 8], strides = [1, 1]} : vector<8x32xf32> to vector<8x8xf32>
    %75 = vector.shape_cast %74 : vector<8x8xf32> to vector<1x8x8xf32>
    "tpu.trace_start"() <{level = 10 : i32, message = "bnd,bmd->bnm"}> : () -> ()
    %cst_22 = arith.constant dense<0.000000e+00> : vector<1x8x8xf32>
    %76 = tpu.matmul %71, %73, %cst_22 {dimension_numbers = #tpu.dot_dimension_numbers<[2], [2], [1], [1], [0, 0, 0, 1, 1, 1], [0], [0]>} : vector<1x8x8xf32>, vector<1x8x8xf32>, vector<1x8x8xf32> -> vector<1x8x8xf32>
    "tpu.trace_stop"() : () -> ()
    %cst_23 = arith.constant dense<0xFF800000> : vector<1x8xf32>
    %77 = vector.multi_reduction <maximumf>, %76, %cst_23 [2] : vector<1x8x8xf32> to vector<1x8xf32>
    %78 = vector.shape_cast %77 : vector<1x8xf32> to vector<1x8x1xf32>
    %79 = vector.broadcast %78 : vector<1x8x1xf32> to vector<1x8x8xf32>
    %80 = arith.subf %76, %79 : vector<1x8x8xf32>
    %81 = math.exp %80 : vector<1x8x8xf32>
    %cst_24 = arith.constant dense<0.000000e+00> : vector<1x8xf32>
    %82 = vector.multi_reduction <add>, %81, %cst_24 [2] : vector<1x8x8xf32> to vector<1x8xf32>
    %83 = vector.shape_cast %82 : vector<1x8xf32> to vector<1x8x1xf32>
    "tpu.trace_start"() <{level = 10 : i32, message = "bnm,bmd->bnd"}> : () -> ()
    %cst_25 = arith.constant dense<0.000000e+00> : vector<1x8x8xf32>
    %84 = tpu.matmul %81, %75, %cst_25 {dimension_numbers = #tpu.dot_dimension_numbers<[2], [1], [1], [2], [0, 0, 0, 1, 1, 2], [0], [0]>} : vector<1x8x8xf32>, vector<1x8x8xf32>, vector<1x8x8xf32> -> vector<1x8x8xf32>
    "tpu.trace_stop"() : () -> ()
    %85 = tpu.reciprocal %83 {approx = true} : vector<1x8x1xf32> -> vector<1x8x1xf32>
    %86 = vector.broadcast %85 : vector<1x8x1xf32> to vector<1x8x8xf32>
    %87 = arith.mulf %84, %86 : vector<1x8x8xf32>
    %88 = vector.shape_cast %87 : vector<1x8x8xf32> to vector<8x8xf32>
    %c0_26 = arith.constant 0 : index
    %c24 = arith.constant 24 : index
    %89 = vector.load %arg7[%c0_26, %c24] : memref<8x32xf32, #tpu.memory_space<vmem>>, vector<8x8xf32>
    tpu.vector_store %arg7[%c0_26, %c24], %88 {strides = array<i32>} : memref<8x32xf32, #tpu.memory_space<vmem>>, vector<8x8xf32>,
    %c0_27 = arith.constant 0 : index
    %c0_28 = arith.constant 0 : index
    %90 = vector.load %arg7[%c0_27, %c0_28] : memref<8x32xf32, #tpu.memory_space<vmem>>, vector<8x32xf32>
    %c0_29 = arith.constant 0 : index
    %c0_30 = arith.constant 0 : index
    %91 = vector.load %arg4[%c0_29, %c0_30] : memref<32x32xf32, #tpu.memory_space<vmem>>, vector<32x32xf32>
    %cst_31 = arith.constant dense<0.000000e+00> : vector<8x32xf32>
    %92 = tpu.matmul %90, %91, %cst_31 {dimension_numbers = #tpu.dot_dimension_numbers<[1], [0], [0], [1], [0, 0, 1, 1], [], []>} : vector<8x32xf32>, vector<32x32xf32>, vector<8x32xf32> -> vector<8x32xf32>
    %c0_32 = arith.constant 0 : index
    %c0_33 = arith.constant 0 : index
    %93 = vector.load %arg5[%c0_32, %c0_33] : memref<1x32xf32, #tpu.memory_space<vmem>>, vector<1x32xf32>
    %94 = vector.broadcast %93 : vector<1x32xf32> to vector<8x32xf32>
    %95 = arith.addf %92, %94 : vector<8x32xf32>
    %96 = vector.shape_cast %95 : vector<8x32xf32> to vector<1x8x32xf32>
    %c0_34 = arith.constant 0 : index
    %c0_35 = arith.constant 0 : index
    %c0_36 = arith.constant 0 : index
    %97 = vector.load %arg6[%c0_34, %c0_35, %c0_36] : memref<1x8x32xf32, #tpu.memory_space<vmem>>, vector<1x8x32xf32>
    tpu.vector_store %arg6[%c0_34, %c0_35, %c0_36], %96 {strides = array<i32>} : memref<1x8x32xf32, #tpu.memory_space<vmem>>, vector<1x8x32xf32>,
    return
  }
  func.func @transform_0(%arg0: i32) -> (i32, i32, i32) {
    %c0_i32 = arith.constant 0 : i32
    %c0_i32_0 = arith.constant 0 : i32
    %c0_i32_1 = arith.constant 0 : i32
    return %arg0, %c0_i32, %c0_i32_0 : i32, i32, i32
  }
  func.func @transform_1(%arg0: i32) -> (i32, i32) {
    %c0_i32 = arith.constant 0 : i32
    %c0_i32_0 = arith.constant 0 : i32
    %c0_i32_1 = arith.constant 0 : i32
    return %c0_i32, %c0_i32_0 : i32, i32
  }
  func.func @transform_2(%arg0: i32) -> (i32, i32) {
    %c0_i32 = arith.constant 0 : i32
    %c0_i32_0 = arith.constant 0 : i32
    %c0_i32_1 = arith.constant 0 : i32
    return %c0_i32, %c0_i32_0 : i32, i32
  }
  func.func @transform_3(%arg0: i32) -> (i32, i32) {
    %c0_i32 = arith.constant 0 : i32
    %c0_i32_0 = arith.constant 0 : i32
    %c0_i32_1 = arith.constant 0 : i32
    return %c0_i32, %c0_i32_0 : i32, i32
  }
  func.func @transform_4(%arg0: i32) -> (i32, i32) {
    %c0_i32 = arith.constant 0 : i32
    %c0_i32_0 = arith.constant 0 : i32
    %c0_i32_1 = arith.constant 0 : i32
    return %c0_i32, %c0_i32_0 : i32, i32
  }
  func.func @transform_5(%arg0: i32) -> (i32, i32, i32) {
    %c0_i32 = arith.constant 0 : i32
    %c0_i32_0 = arith.constant 0 : i32
    %c0_i32_1 = arith.constant 0 : i32
    return %arg0, %c0_i32, %c0_i32_0 : i32, i32, i32
  }
}

</mosaic_0001>

<bundles_post_ra>
// kernel: tpu_custom_call.1
= control target key start
LH: loop header
LB: loop body
LE: loop exit
PB: predicated region body
PF: predicated region fallthrough
CT: control target
= control target key end

     0   :  { %10 = vsyncpa [#allocation4], 0  ;;  %s1901_s0 = inlined_call_operand.hbm [shape: f32[2,8,32], index: 0, kind: input, shape index: {}]   ;;  %s1902_s1 = inlined_call_operand.hbm [shape: f32[32,96], index: 1, kind: input, shape index: {}]   ;;  %s1903_s2 = inlined_call_operand.vmem [shape: f32[1,96], index: 2, kind: input, shape index: {}]   ;;  %s1904_s3 = inlined_call_operand.hbm [shape: f32[32,32], index: 3, kind: input, shape index: {}]   ;;  %s1905_s4 = inlined_call_operand.vmem [shape: f32[1,32], index: 4, kind: input, shape index: {}]   ;;  %s1906_s5 = inlined_call_operand.hbm [shape: f32[2,8,32], index: 5, kind: output, shape index: {}]  }
   0x1   :  { %12 = vsyncpa [#allocation4 + $0x1], 0 }
   0x2   :  { %13 = vsyncpa [#allocation7], 0 }
   0x3   :  { %14 = vsyncpa [#allocation5], 0 }
   0x4   :  { %16 = vsyncpa [#allocation5 + $0x1], 0  ;;  %s1646_s18 = smov 0   ;;  %s1648_s19 = smov 0  }
   0x5   :  { %s1650_s20 = smov 0   ;;  %s1652_s21 = smov 0  }
   0x6 LB: > { %s1667_s22 = sadd.s32 4294967295, %s1592_s21   ;;  %s1223_s23 = sadd.s32 4294967294, %s1592_s21   ;;  %s1592_s21 = sphi %s1652_s21, %s1928_s21   ;;  %s1588_s20 = sphi %s1650_s20, %s1927_s20   ;;  %s1584_s19 = sphi %s1648_s19, %s1926_s19   ;;  %s1580_s18 = sphi %s1646_s18, %s1925_s18  }
   0x7   : > { %p42_p0 = scmp.ne.s32.totalorder %s1584_s19, %s1580_s18  ;;  %p1907_p1 = scmp.eq.s32.totalorder %s1667_s22, 0 }
   0x8   : > { %p156_p3 = scmp.eq.s32.totalorder %s1223_s23, 1  ;;  %p1224_p5 = scmp.ge.s32.totalorder %s1592_s21, 1 }
   0x9   : > { %p1676_p4 = por %p1907_p1, %p42_p0  ;;  %p163_p7 = scmp.lt.s32.totalorder %s1592_s21, 3 }
   0xa   : > { %p1681_p6 = por %p156_p3, %p42_p0  ;;  %s1594_s27 = smov [#allocation6]  }
   0xb   : > { %s1911_s24 = scalar_select %p1676_p4, 1, 0 }
   0xc   : > { %s1912_s25 = scalar_select %p1681_p6, 1, 0 }
   0xd   : > { %p1686_p8 = pnand %p1224_p5, %p163_p7  ;;  %s175_s28 = sshll.u32 %s1594_s27, 4  ;;  %s176_s28 = int_to_ptr.vmem [resolvable:$true] %s175_s28 }
   0xe   : > { %s1595_s30 = smov [#allocation8]   ;;  %s1455_s7 = scalar_lea.vmem %s176_s28, 512 }
   0xf   : > { %s1913_s26 = scalar_select %p1686_p8, 1, 0 }
  0x10   : > { %p1355_p9 = pneg %p1686_p8  ;;  %s191_s6 = sshll.u32 %s1595_s30, 4  ;;  %s192_s6 = int_to_ptr.vmem [resolvable:$true] %s191_s6 }
  0x11   : > { %p1456_p13 = scmp.ne.s32.totalorder %s176_s28, %s1455_s7  ;;  %p1463_p5 = scmp.lt.s32.totalorder %s176_s28, %s176_s28 }
  0x12   : > { %p1695_p11 = pnand %p1355_p9, %p1907_p1  ;;  %p1464_p7 = scmp.lt.s32.totalorder %s1455_s7, %s1455_s7 }
  0x14   : > { %p1446_p12 = pneg %p1695_p11  ;;  %p1465_p10 = por %p1464_p7, %p1463_p5 }
  0x16   : > { %p1458_p0 = pnand %p1456_p13, %p1446_p12 }
  0x18   : > { %p1459_p3 = pneg %p1458_p0 }
  0x1a   : > { %p1466_p9 = pnand %p1465_p10, %p1459_p3 }
  0x1c   : > { %1469 = shalt.err (!%p1466_p9)
}
  0x1d   : > { %s1596_s8 = smov 128   ;;  %s1597_s9 = smov 8  }
  0x1e   : > { %1358 = dma.hbm_to_vmem [thread:$0]  (!%p1695_p11), %s1902_s1, 512, %s176_s28, [#allocation7], %s1596_s8, %s1596_s8, %s1597_s9  }
  0x1f   : > { %s1481_s12 = scalar_lea.vmem %s192_s6, 512  ;;  %p1489_p2 = scmp.lt.s32.totalorder %s192_s6, %s192_s6 }
  0x20   : > { %p1482_p1 = scmp.ne.s32.totalorder %s192_s6, %s1481_s12  ;;  %p1490_p6 = scmp.lt.s32.totalorder %s1481_s12, %s1481_s12 }
  0x22   : > { %p1484_p13 = pnand %p1482_p1, %p1446_p12  ;;  %p1491_p5 = por %p1490_p6, %p1489_p2 }
  0x24   : > { %p1485_p0 = pneg %p1484_p13 }
  0x26   : > { %p1492_p10 = pnand %p1491_p5, %p1485_p0 }
  0x28   : > { %1495 = shalt.err (!%p1492_p10)
}
  0x29   : > { %1361 = dma.hbm_to_vmem [thread:$0]  (!%p1695_p11), %s1904_s3, 512, %s192_s6, [#allocation7], %s1596_s8, %s1596_s8, %s1597_s9  }
  0x2a   : > { %s1718_s15 = sadd.s32 1, %s1592_s21   ;;  %s29_s16 = sadd.s32 1, %s1588_s20 }
  0x2b   : > { %s26_s17 = ssub.s32 %s1592_s21, %s1718_s15  ;;  %p36_p1 = scmp.ne.s32.totalorder %s1588_s20, %s1584_s19 }
  0x2c   : > { %p27_p2 = scmp.eq.s32.totalorder %s26_s17, 0  ;;  %p37_p6 = scmp.eq.s32.totalorder %s1592_s21, 0 }
  0x2d   : > { %p1915_p12 = scmp.eq.s32.totalorder %s1667_s22, 1  ;;  %p1372_p7 = scmp.lt.s32.totalorder %s1592_s21, 2 }
  0x2e   : > { %s1734_s27 = scalar_select %p27_p2, %s1588_s20, %s29_s16  }
  0x2f   : > { %p1728_p3 = por %p1915_p12, %p36_p1  ;;  %p38_p9 = por %p37_p6, %p36_p1 }
  0x30   : > { %s208_s28 = sand.u32 1, %s1588_s20   ;;  %s1229_s30 = sshll.u32 %s1592_s21, 7 }
  0x31   : > { %s1916_s23 = scalar_select %p1728_p3, 1, 0 }
  0x32   : > { %s1228_s29 = sshll.u32 %s208_s28, 3  ;;  %s1741_s8 = scalar_lea.hbm %s1901_s0, %s1229_s30 }
  0x33   : > { %s212_s9 = scalar_lea.vmem [#allocation3], %s1228_s29  ;;  %p1743_p11 = pnand %p1372_p7, %p38_p9 }
  0x34   : > { %s219_s10 = sshll.u32 %s212_s9, 4  ;;  %s209_s12 = scalar_lea.sflag [#allocation4], %s208_s28  ;;  %s220_s10 = int_to_ptr.vmem [resolvable:$true] %s219_s10 }
  0x35   : > { %s1496_s13 = scalar_lea.hbm %s1741_s8, 128  ;;  %p1498_p0 = pneg %p1743_p11 }
  0x36   : > { %p1497_p13 = scmp.ne.s32.totalorder %s1741_s8, %s1496_s13  ;;  %s1501_s17 = scalar_lea.hbm %s1901_s0, 256 }
  0x37   : > { %p1502_p1 = scmp.lt.s32.totalorder %s1741_s8, %s1901_s0  ;;  %p1503_p2 = scmp.lt.s32.totalorder %s1501_s17, %s1496_s13 }
  0x38   : > { %p1499_p5 = pnand %p1498_p0, %p1497_p13 }
  0x39   : > { %p1504_p6 = por %p1503_p2, %p1502_p1 }
  0x3a   : > { %p1500_p10 = pneg %p1499_p5 }
  0x3c   : > { %p1505_p12 = pnand %p1504_p6, %p1500_p10 }
  0x3e   : > { %1508 = shalt.err (!%p1505_p12)
}
  0x3f   : > { %s1509_s6 = scalar_lea.vmem %s220_s10, 128  ;;  %s1598_s28 = smov [#allocation3]  }
  0x40   : > { %p1510_p7 = scmp.ne.s32.totalorder %s220_s10, %s1509_s6  ;;  %s1514_s7 = sshll.u32 %s1598_s28, 4  ;;  %s1515_s7 = int_to_ptr.vmem [resolvable:$false] %s1514_s7 }
  0x41   : > { %s1516_s9 = scalar_lea.vmem %s1515_s7, 256  ;;  %p1517_p13 = scmp.lt.s32.totalorder %s220_s10, %s1515_s7 }
  0x42   : > { %p1512_p9 = pnand %p1510_p7, %p1498_p0  ;;  %p1518_p5 = scmp.lt.s32.totalorder %s1516_s9, %s1509_s6 }
  0x44   : > { %p1513_p3 = pneg %p1512_p9  ;;  %p1519_p4 = por %p1518_p5, %p1517_p13 }
  0x46   : > { %p1520_p8 = pnand %p1519_p4, %p1513_p3 }
  0x48   : > { %1523 = shalt.err (!%p1520_p8)
}
  0x49   : > { %1365 = dma.hbm_to_vmem [thread:$0]  (!%p1743_p11), %s1741_s8, 128, %s220_s10, %s209_s12  }
  0x4a   : > { %p1918_p10 = scmp.ne.s32.totalorder %s1913_s26, 0 }
  0x4b   : > { %s1764_s13 = sand.u32 (!%p1918_p10), 1, %s1584_s19   ;;  %p1919_p4 = scmp.ne.s32.totalorder (!%p1918_p10), %s1911_s24, 0 }
  0x4c   : > { %228 = sbr.rel (%p1918_p10) target bundleno = 1646 (0x66e), region = 40  ;;  %s1231_s14 = sshll.u32 (!%p1918_p10), %s1764_s13, 3 }
  0x4d   : > { %s231_s16 = scalar_lea.sflag (!%p1918_p10), [#allocation4], %s1764_s13  ;;  %s234_s17 = scalar_lea.vmem (!%p1918_p10), [#allocation3], %s1231_s14 }
  0x51   : > { %1567 = dma.done.wait (%p1919_p4), %s231_s16, 128  }
  0x52   : > { %1569 = vsyncadd (%p1919_p4), %s231_s16, 4294967168  ;;  %p1920_p8 = scmp.eq.s32.totalorder %s1667_s22, 0 }
  0x54   : > { %1571 = dma.done.wait (%p1920_p8), [#allocation7], 1024   ;;  %p1921_p3 = pmov %p1920_p8 }
  0x55   : > { %v1599_v0 = vmov 0.0   ;;  %vm1600_vm0 = vmmov 0   ;;  %v273_v1 = vld [vmem:[#allocation6 + $0x18] sm:$0xff]  ;;  %v272_v2 = vld [vmem:[#allocation6 + $0x10] sm:$0xff]  ;;  %v271_v3 = vld [vmem:[#allocation6 + $0x8] sm:$0xff]  ;;  %vm281_vm1 = vcmask 261120  }
  0x56   : > { %1573 = vsyncadd (%p1921_p3), [#allocation7], 4294966272  ;;  %1281 = vmatprep.subr.mxu0 %v1599_v0  ;;  %1289 = vmatprep.mubr.msk.f32.mxu0 %vm1600_vm0, %v1599_v0  ;;  %v270_v4 = vld [vmem:[#allocation6] sm:$0xff]  ;;  %v269_v5 = vld [vmem:[%s234_s17] sm:$0xff]  ;;  %s1601_s8 = smov 64   ;;  %s1602_s10 = smov 96  }
  0x57   : > { %1292 = vmatprep.subr.mxu1 %v1599_v0  ;;  %1294 = vmatprep.mubr.msk.f32.mxu1 %vm1600_vm0, %v1599_v0  ;;  %v1235_v6 = vld [vmem:[%s1903_s2] ss:$0 sm:$0xff]  ;;  %s1603_s11 = smov 88   ;;  %s1604_s12 = smov 120   ;;  %vm358_vm2 = vcmask 64512   ;;  %v1038_v61 = vld [vmem:[#allocation8 + $0x18] sm:$0xff] }
  0x58   : > { %1282 = vmatpush3.msra.mxu0 %v273_v1  ;;  %s1605_s30 = smov 80   ;;  %s1606_s29 = smov 112   ;;  %v1037_v62 = vld [vmem:[#allocation8 + $0x10] sm:$0xff]  ;;  %vm690_vm3 = vcmask 130112   ;;  %vm861_vm4 = vcmask 195712   ;;  %vm1032_vm5 = vcmask 261312  }
  0x59   : > { %1283 = vmatprep.subr.mxu0 %v1599_v0  ;;  %s1607_s6 = smov 72   ;;  %s1608_s28 = smov 104  }
  0x5a   : > { %1284 = vmatpush3.msra.mxu0 %v272_v2  ;;  %s1609_s7 = smov 56   ;;  %s1610_s9 = smov 40   ;;  %v1036_v2 = vld [vmem:[#allocation8 + $0x8] sm:$0xff] }
  0x5b   : > { %1285 = vmatprep.subr.mxu0 %v1599_v0  ;;  %s1611_s16 = smov 48   ;;  %s1612_s17 = smov 8  }
  0x5c   : > { %1286 = vmatpush3.msra.mxu0 %v271_v3  ;;  %s1613_s24 = smov 16   ;;  %s1614_s26 = smov 24  }
  0x5d   : > { %1287 = vmatprep.subr.mxu0 %v1599_v0  ;;  %p1922_p0 = scmp.ne.s32.totalorder %s1916_s23, 0 }
  0x5e   : > { %1288 = vmatpush3.msra.mxu0 %v270_v4 }
  0x5f   : > { %1290 = vmatmul.mubr.msk.f32.vlgmr.msra.gmra.mxu0 %vm281_vm1, %v269_v5  ;;  %1312 = vmatprep.subr.mxu0 %v1599_v0  ;;  %v1035_v5 = vld [vmem:[#allocation8] sm:$0xff] }
  0x60   : > { %1314 = vmatprep.mubr.msk.f32.mxu0 %vm1600_vm0, %v1599_v0 }
 0x11f   : > { %v351_v7 = vpop.f32.mrf.mxu0 }
 0x120   : > { %v1794_v8 = vadd.f32 %v1235_v6, %v351_v7 }
 0x121   : > { %v1291_v9 = vpop.f32.mrf.mxu0 }
 0x122   : > { %442 = vrot.lane.b32.xlu1 %v1794_v8, %s1601_s8  ;;  %356 = vrot.lane.b32.xlu0 %v1794_v8, %s1602_s10 }
 0x126   : > { %523 = vrot.lane.b32.xlu1 %v1794_v8, %s1603_s11  ;;  %s1252_s11 = sshll.u32 %s1667_s22, 7  ;;  %s1615_s22 = smov [#allocation9]  }
 0x12a   : > { %521 = vrot.lane.b32.xlu1 %v1794_v8, %s1604_s12  ;;  %s268_s12 = scalar_lea.vmem [#allocation9], %s1231_s14  ;;  %s1528_s14 = sshll.u32 %s1615_s22, 4  ;;  %s1529_s14 = int_to_ptr.vmem [resolvable:$false] %s1528_s14 }
 0x12e   : > { %694 = vrot.lane.b32.xlu1 %v1794_v8, %s1605_s30  ;;  %s1134_s30 = sshll.u32 %s268_s12, 4  ;;  %s1135_s30 = int_to_ptr.vmem [resolvable:$true] %s1134_s30 }
 0x12f   : > { %p1531_p6 = scmp.lt.s32.totalorder %s1135_s30, %s1529_s14 }
 0x132   : > { %692 = vrot.lane.b32.xlu1 %v1794_v8, %s1606_s29 }
 0x136   : > { %865 = vrot.lane.b32.xlu1 %v1794_v8, %s1607_s6 }
 0x13a   : > { %863 = vrot.lane.b32.xlu1 %v1794_v8, %s1608_s28  ;;  %s1863_s28 = scalar_lea.hbm %s1906_s5, %s1252_s11 }
 0x194   : > { %v443_v10 = vpop.permute.xlu1 %442  ;;  %v357_v11 = vpop.permute.xlu0 %356 }
 0x195   : > { %1293 = vmatpush3.xpose.msk.msra.mxu1 %vm358_vm2, %v357_v11 }
 0x196   : > { %1297 = vmatprep.subr.mxu1 %v1599_v0 }
 0x198   : > { %v524_v12 = vpop.permute.xlu1 %523  ;;  %1295 = vmatmul.mubr.msk.f32.vlgmr.msra.gmra.mxu1 %vm358_vm2, %v1794_v8 }
 0x199   : > { %1298 = vmatpush3.msra.mxu1 %v443_v10  ;;  %1299 = vmatprep.mubr.msk.f32.mxu1 %vm1600_vm0, %v1599_v0 }
 0x19a   : > { %1302 = vmatprep.subr.mxu1 %v1599_v0 }
 0x19c   : > { %v522_v13 = vpop.permute.xlu1 %521 }
 0x1a0   : > { %v695_v14 = vpop.permute.xlu1 %694 }
 0x1a1   : > { %1313 = vmatpush3.xpose.msk.msra.mxu0 %vm358_vm2, %v695_v14 }
 0x1a2   : > { %1322 = vmatprep.subr.mxu0 %v1599_v0 }
 0x1a4   : > { %v693_v15 = vpop.permute.xlu1 %692 }
 0x1a5   : > { %1315 = vmatmul.mubr.msk.f32.vlgmr.msra.gmra.mxu0 %vm358_vm2, %v693_v15 }
 0x1a6   : > { %1324 = vmatprep.mubr.msk.f32.mxu0 %vm1600_vm0, %v1599_v0 }
 0x1a8   : > { %v866_v16 = vpop.permute.xlu1 %865 }
 0x1a9   : > { %1323 = vmatpush3.xpose.msk.msra.mxu0 %vm358_vm2, %v866_v16 }
 0x1aa   : > { %1332 = vmatprep.subr.mxu0 %v1599_v0 }
 0x1ac   : > { %v864_v17 = vpop.permute.xlu1 %863 }
 0x1ad   : > { %1325 = vmatmul.mubr.msk.f32.vlgmr.msra.gmra.mxu0 %vm358_vm2, %v864_v17  ;;  %v1249_v17 = vld [vmem:[%s1905_s4] ss:$0 sm:$0xff] }
 0x1ae   : > { %1340 = vmatprep.mubr.msk.f32.mxu0 %vm1600_vm0, %v1599_v0  ;;  %1333 = vmatpush3.msra.mxu0 %v1038_v61 }
 0x1af   : > { %1334 = vmatprep.subr.mxu0 %v1599_v0 }
 0x1b0   : > { %1335 = vmatpush3.msra.mxu0 %v1037_v62 }
 0x1b1   : > { %1336 = vmatprep.subr.mxu0 %v1599_v0 }
 0x1b2   : > { %1337 = vmatpush3.msra.mxu0 %v1036_v2 }
 0x1b3   : > { %1338 = vmatprep.subr.mxu0 %v1599_v0 }
 0x1b4   : > { %1339 = vmatpush3.msra.mxu0 %v1035_v5 }
 0x258   : > { %v429_v18 = vpop.f32.mrf.mxu1 }
 0x259   : > { %v433_v19 = vsel %vm358_vm2, %v429_v18, -inf }
 0x25a   : > { %434 = vmax.xlane.f32.xlu0 %v433_v19  ;;  %v1296_v20 = vpop.f32.mrf.mxu1 }
 0x265   : > { %v766_v21 = vpop.f32.mrf.mxu0 }
 0x266   : > { %v770_v25 = vsel %vm358_vm2, %v766_v21, -inf }
 0x267   : > { %v1316_v22 = vpop.f32.mrf.mxu0 }
 0x26d   : > { %v937_v23 = vpop.f32.mrf.mxu0 }
 0x26e   : > { %v941_v26 = vsel %vm358_vm2, %v937_v23, -inf }
 0x26f   : > { %v1326_v24 = vpop.f32.mrf.mxu0 }
 0x270   : > { %608 = vrot.lane.b32.xlu0 %v1794_v8, %s1609_s7  ;;  %s1121_s7 = scalar_lea.sflag [#allocation5], %s1764_s13 }
 0x28f   : > { %771 = vmax.xlane.f32.xlu0 %v770_v25 }
 0x293   : > { %942 = vmax.xlane.f32.xlu0 %v941_v26 }
 0x2a9   : > { %950 = vrot.lane.b32.xlu0 %v1794_v8, %s1610_s9  ;;  %s1524_s9 = scalar_lea.vmem %s1135_s30, 128 }
 0x2aa   : > { %p1525_p11 = scmp.ne.s32.totalorder %s1135_s30, %s1524_s9 }
 0x2ac   : > { %p1526_p1 = pnand %p1525_p11, %p1922_p0 }
 0x2ae   : > { %p1527_p2 = pneg %p1526_p1 }
 0x2e3   : > { %v435_v27 = vpop.xlane.xlu0 %434 }
 0x2e4   : > { %v436_v28 = vsub.f32 %v429_v18, %v435_v27 }
 0x2e6   : > { %v437_v29 = vmul.f32 1.442695, %v436_v28 }
 0x2e7   : > { %v609_v31 = vpop.permute.xlu0 %608 }
 0x2e8   : > { %1428 = vpow2.f32 %v437_v29 }
 0x2f5   : > { %v1429_v30 = vpop.eup %1428 }
 0x2f6   : > { %1300 = vmatmul.mubr.msk.f32.vlgmr.msra.gmra.mxu1 %vm358_vm2, %v1429_v30  ;;  %v439_v54 = vsel %vm358_vm2, %v1429_v30, 0.0 }
 0x2f7   : > { %1303 = vmatpush3.xpose.msk.msra.mxu1 %vm358_vm2, %v524_v12  ;;  %1304 = vmatprep.mubr.msk.f32.mxu1 %vm1600_vm0, %v1599_v0 }
 0x2f8   : > { %1307 = vmatprep.subr.mxu1 %v1599_v0 }
 0x2fa   : > { %1305 = vmatmul.mubr.msk.f32.vlgmr.msra.gmra.mxu1 %vm358_vm2, %v522_v13 }
 0x2fb   : > { %1308 = vmatpush3.msra.mxu1 %v609_v31  ;;  %1309 = vmatprep.mubr.msk.f32.mxu1 %vm1600_vm0, %v1599_v0 }
 0x2fc   : > { %1317 = vmatprep.subr.mxu1 %v1599_v0 }
 0x318   : > { %v772_v37 = vpop.xlane.xlu0 %771 }
 0x319   : > { %v773_v38 = vsub.f32 %v766_v21, %v772_v37 }
 0x31b   : > { %v774_v39 = vmul.f32 1.442695, %v773_v38 }
 0x31c   : > { %v943_v42 = vpop.xlane.xlu0 %942 }
 0x31d   : > { %1430 = vpow2.f32 %v774_v39  ;;  %v944_v43 = vsub.f32 %v937_v23, %v943_v42 }
 0x31f   : > { %v945_v46 = vmul.f32 1.442695, %v944_v43 }
 0x320   : > { %v951_v52 = vpop.permute.xlu0 %950 }
 0x32a   : > { %v1431_v40 = vpop.eup %1430 }
 0x32b   : > { %v776_v41 = vsel %vm358_vm2, %v1431_v40, 0.0 }
 0x3b6   : > { %v514_v32 = vpop.f32.mrf.mxu1 }
 0x3b8   : > { %v1301_v33 = vpop.f32.mrf.mxu1 }
 0x3ba   : > { %v595_v34 = vpop.f32.mrf.mxu1 }
 0x3bb   : > { %v599_v35 = vsel %vm358_vm2, %v595_v34, -inf }
 0x3bc   : > { %600 = vmax.xlane.f32.xlu1 %v599_v35  ;;  %v1306_v36 = vpop.f32.mrf.mxu1 }
 0x3cd   : > { %779 = vrot.lane.b32.xlu1 %v1794_v8, %s1611_s16  ;;  %s1530_s16 = scalar_lea.vmem %s1529_s14, 256 }
 0x3ce   : > { %p1532_p12 = scmp.lt.s32.totalorder %s1530_s16, %s1524_s9 }
 0x3d0   : > { %p1533_p7 = por %p1532_p12, %p1531_p6 }
 0x3d2   : > { %p1534_p9 = pnand %p1533_p7, %p1527_p2 }
 0x3f1   : > { %777 = vadd.xlane.f32.xlu1 %v776_v41 }
 0x445   : > { %v601_v44 = vpop.xlane.xlu1 %600 }
 0x446   : > { %v602_v45 = vsub.f32 %v595_v34, %v601_v44 }
 0x448   : > { %v603_v47 = vmul.f32 1.442695, %v602_v45 }
 0x449   : > { %v780_v49 = vpop.permute.xlu1 %779 }
 0x44a   : > { %1432 = vpow2.f32 %v603_v47 }
 0x44b   : > { %1434 = vpow2.f32 %v945_v46 }
 0x457   : > { %v1433_v48 = vpop.eup %1432 }
 0x458   : > { %1310 = vmatmul.mubr.msk.f32.vlgmr.msra.gmra.mxu1 %vm358_vm2, %v1433_v48  ;;  %v605_v50 = vsel %vm358_vm2, %v1433_v48, 0.0  ;;  %v1435_v51 = vpop.eup %1434 }
 0x459   : > { %1318 = vmatpush3.msra.mxu1 %v780_v49  ;;  %606 = vadd.xlane.f32.xlu0 %v605_v50  ;;  %v947_v53 = vsel %vm358_vm2, %v1435_v51, 0.0 }
 0x45a   : > { %1319 = vmatprep.mubr.msk.f32.mxu1 %vm1600_vm0, %v1599_v0  ;;  %1327 = vmatprep.subr.mxu1 %v1599_v0 }
 0x45c   : > { %1320 = vmatmul.mubr.msk.f32.vlgmr.msra.gmra.mxu1 %vm358_vm2, %v1431_v40 }
 0x45d   : > { %1328 = vmatpush3.msra.mxu1 %v951_v52  ;;  %948 = vadd.xlane.f32.xlu0 %v947_v53 }
 0x45e   : > { %1329 = vmatprep.mubr.msk.f32.mxu1 %vm1600_vm0, %v1599_v0 }
 0x460   : > { %1330 = vmatmul.mubr.msk.f32.vlgmr.msra.gmra.mxu1 %vm358_vm2, %v1435_v51 }
 0x461   : > { %440 = vadd.xlane.f32.xlu0 %v439_v54 }
 0x47a   : > { %v778_v60 = vpop.xlane.xlu1 %777 }
 0x4e2   : > { %v607_v55 = vpop.xlane.xlu0 %606 }
 0x4e6   : > { %v949_v56 = vpop.xlane.xlu0 %948 }
 0x4ea   : > { %v441_v57 = vpop.xlane.xlu0 %440 }
 0x4eb   : > { %1436 = vrcp.f32 %v441_v57 }
 0x4ec   : > { %1438 = vrcp.f32 %v607_v55 }
 0x4ed   : > { %1440 = vrcp.f32 %v778_v60 }
 0x4ee   : > { %1442 = vrcp.f32 %v949_v56 }
 0x4f8   : > { %v1437_v58 = vpop.eup %1436 }
 0x4f9   : > { %v519_v59 = vmul.f32 %v1437_v58, %v514_v32  ;;  %v1439_v63 = vpop.eup %1438 }
 0x4fa   : > { %v1441_v6 = vpop.eup %1440 }
 0x4fb   : > { %520 = vst.msk [vmem:[#allocation2] sm:$0xff] %vm358_vm2, %v519_v59  ;;  %v1443_v10 = vpop.eup %1442 }
 0x518   : > { %v680_v1 = vpop.f32.mrf.mxu1 }
 0x519   : > { %v685_v3 = vmul.f32 %v1439_v63, %v680_v1 }
 0x51a   : > { %v1311_v4 = vpop.f32.mrf.mxu1 }
 0x51b   : > { %687 = vrot.lane.b32.xlu0 %v685_v3, %s1612_s17 }
 0x51c   : > { %v851_v7 = vpop.f32.mrf.mxu1 }
 0x51d   : > { %v856_v8 = vmul.f32 %v1441_v6, %v851_v7 }
 0x51e   : > { %v1321_v9 = vpop.f32.mrf.mxu1 }
 0x51f   : > { %858 = vrot.lane.b32.xlu1 %v856_v8, %s1613_s24 }
 0x520   : > { %v1022_v11 = vpop.f32.mrf.mxu1 }
 0x521   : > { %v1027_v12 = vmul.f32 %v1443_v10, %v1022_v11 }
 0x522   : > { %v1331_v13 = vpop.f32.mrf.mxu1 }
 0x523   : > { %1029 = vrot.lane.b32.xlu0 %v1027_v12, %s1614_s26 }
 0x58d   : > { %v688_v14 = vpop.permute.xlu0 %687 }
 0x58e   : > { %691 = vst.msk [vmem:[#allocation2] sm:$0xff] %vm690_vm3, %v688_v14 }
 0x591   : > { %v859_v15 = vpop.permute.xlu1 %858 }
 0x592   : > { %862 = vst.msk [vmem:[#allocation2] sm:$0xff] %vm861_vm4, %v859_v15 }
 0x595   : > { %v1030_v0 = vpop.permute.xlu0 %1029 }
 0x596   : > { %1033 = vst.msk [vmem:[#allocation2] sm:$0xff] %vm1032_vm5, %v1030_v0 }
 0x59d   : > { %v1034_v16 = vld [vmem:[#allocation2] sm:$0xff] }
 0x59e   : > { %1341 = vmatmul.mubr.msk.f32.vlgmr.msra.gmra.mxu0 %vm281_vm1, %v1034_v16 }
 0x65e   : > { %v1115_v18 = vpop.f32.mrf.mxu0 }
 0x65f   : > { %v1116_v19 = vadd.f32 %v1249_v17, %v1115_v18 }
 0x660   : > { %v1342_v20 = vpop.f32.mrf.mxu0 }
 0x661   : > { %1119 = vst.msk [vmem:[%s268_s12] sm:$0xff] %vm281_vm1, %v1116_v19 }
 0x662   : > { %1537 = shalt.err (!%p1534_p9)
}
 0x663   : > { %s1538_s17 = scalar_lea.hbm %s1863_s28, 128  ;;  %s1542_s26 = scalar_lea.hbm %s1906_s5, 256 }
 0x664   : > { %p1539_p13 = scmp.ne.s32.totalorder %s1863_s28, %s1538_s17  ;;  %p1543_p4 = scmp.lt.s32.totalorder %s1863_s28, %s1906_s5 }
 0x665   : > { %p1544_p8 = scmp.lt.s32.totalorder %s1542_s26, %s1538_s17 }
 0x666   : > { %p1540_p5 = pnand %p1539_p13, %p1922_p0 }
 0x667   : > { %p1545_p3 = por %p1544_p8, %p1543_p4 }
 0x668   : > { %p1541_p10 = pneg %p1540_p5 }
 0x66a   : > { %p1546_p11 = pnand %p1545_p3, %p1541_p10 }
 0x66c   : > { %1549 = shalt.err (!%p1546_p11)
}
 0x66d   : > { %1353 = dma.vmem_to_hbm [thread:$0]  (%p1922_p0), %s1135_s30, 128, %s1863_s28, %s1121_s7  }
 0x66e PF: > { %s1146_s11 = sand.u32 1, %s1580_s18   ;;  %p1923_p1 = scmp.ne.s32.totalorder %s1912_s25, 0 }
 0x66f   : > { %p1924_p2 = scmp.ge.s32.totalorder %s1592_s21, 2  ;;  %s1147_s12 = scalar_lea.sflag [#allocation5], %s1146_s11 }
 0x671   : > { %p1367_p6 = pnand %p1924_p2, %p1923_p1 }
 0x673   : > { %p1368_p12 = pneg %p1367_p6 }
 0x675   : > { %1575 = dma.done.wait (%p1368_p12), %s1147_s12, 128  }
 0x676   : > { %1577 = vsyncadd (%p1368_p12), %s1147_s12, 4294967168  ;;  %p19_p7 = scmp.ge.s32.totalorder %s1718_s15, 4   ;;  %s1925_s18 = smov %s1584_s19 }
 0x677   : > { %s1926_s19 = smov %s1588_s20  ;;  %s1927_s20 = smov %s1734_s27 }
 0x678   : > { %s1928_s21 = smov %s1718_s15  ;;  %21 = sbr.rel (!%p19_p7) target bundleno = 6 (0x6), region = 93 }
 0x67d   :  { %1152 = vsyncpa [#allocation4], 1 }
 0x67e   :  { %1154 = vsyncpa [#allocation4 + $0x1], 1 }
 0x67f   :  { %1155 = vsyncpa [#allocation7], 1 }
 0x680   :  { %1156 = vsyncpa [#allocation5], 1 }
 0x681   :  { %1158 = vsyncpa [#allocation5 + $0x1], 1 }

</bundles_post_ra>
